<compile_context>
chip_gen: v7x
topology: tpu7x:2x2x1
jax: 0.10.0
libtpu: 0.0.40
codegen_flags: <defaults>
</compile_context>

<pallas_src>
import functools

import jax
import jax.numpy as jnp
from jax import lax
from jax.experimental import pallas as pl
from jax.experimental.pallas import tpu as pltpu


def _ls_ce_kernel(pred_ref, tgt_ref, out_ref, *, smoothing, num_classes, batch, tb):
    # pred_ref: (tb, C) logits, natural layout, native dtype
    # tgt_ref : (1, tb)  int32 targets (batch on lanes)
    # out_ref : (1, 128) f32 per-tile partial sum (broadcast over lanes -> unmasked vst)
    i = pl.program_id(0)

    # Cast in-kernel (inputs may be bf16), then relayout to (C, tb) so the batch dim
    # rides the 128-lane axis and every class reduction is a tiny sublane reduce.
    pred = jnp.transpose(pred_ref[...].astype(jnp.float32), (1, 0))       # (C, tb)
    tgt = tgt_ref[...]                                                    # (1, tb)

    # Numerically-stable log-softmax pieces over the class (sublane) axis.
    col_max = jnp.max(pred, axis=0, keepdims=True)                        # (1, tb)
    shifted = pred - col_max                                              # (C, tb)
    lse = jnp.log(jnp.sum(jnp.exp(shifted), axis=0, keepdims=True))       # (1, tb)

    # sum_c log_prob[c] = sum_c shifted[c] - C * lse
    sum_lp = jnp.sum(shifted, axis=0, keepdims=True) - jnp.float32(num_classes) * lse

    # log_prob[target] via one masked sublane reduce (no dense true_dist matrix).
    class_ids = lax.broadcasted_iota(jnp.int32, pred.shape, 0)            # (C, tb)
    shifted_t = jnp.sum(
        jnp.where(class_ids == tgt, shifted, jnp.float32(0.0)),
        axis=0, keepdims=True,
    )                                                                     # (1, tb)
    lp_t = shifted_t - lse                                                # (1, tb)

    coeff_on = jnp.float32(1.0 - smoothing - smoothing / (num_classes - 1))
    coeff_off = jnp.float32(smoothing / (num_classes - 1))
    per_col = -(coeff_on * lp_t + coeff_off * sum_lp)                     # (1, tb)

    # Mask batch columns past the true batch size (ragged final tile).  Must be a
    # select, not a multiply: out-of-bounds lanes hold unspecified data (inf/NaN).
    col_idx = i * tb + lax.broadcasted_iota(jnp.int32, per_col.shape, 1)
    per_col = jnp.where(col_idx < batch, per_col, jnp.float32(0.0))

    partial = jnp.sum(per_col, axis=1, keepdims=True)                     # (1, 1)
    out_ref[...] = jnp.broadcast_to(partial, out_ref.shape)               # (1, 128)


def label_smoothing_cross_entropy(pred, target, *, smoothing=0.1, num_classes=5,
                                  tile_rows=None):
    """Matches LabelSmoothingCrossEntropy(smoothing, num_classes).forward(pred, target)."""
    B, C = pred.shape
    assert C == num_classes, "pred class dim must equal num_classes"

    # Rows (examples) per grid step.  Large tiles amortize the ~0.35 us/step grid
    # overhead and make every pred DMA one contiguous multi-hundred-KiB burst; the
    # double-buffered inputs plus in-kernel f32 temporaries stay well under the
    # 32 MiB scoped-VMEM default on every generation (incl. v7x's 64 MiB VMEM).
    cap = 65536 if tile_rows is None else int(tile_rows)
    if B <= cap:
        tb = B                           # single block == full array (always legal)
    else:
        tb = max((cap // 128) * 128, 128)  # tiled: keep lane/sublane alignment
    grid_b = (B + tb - 1) // tb          # Pallas clips the ragged final block; no pad

    # Metadata-only reshape (no HBM pass); keep logits in their native dtype.
    tgt = target.astype(jnp.int32).reshape(1, B)

    # TODO(synk): if the producing matmul can emit logits already as (C, B), feed that
    # directly and drop the in-kernel transpose entirely.

    kernel = functools.partial(
        _ls_ce_kernel,
        smoothing=float(smoothing),
        num_classes=int(num_classes),
        batch=int(B),
        tb=int(tb),
    )

    out = pl.pallas_call(
        kernel,
        out_shape=jax.ShapeDtypeStruct((1, grid_b * 128), jnp.float32),
        grid=(grid_b,),
        in_specs=[
            pl.BlockSpec((tb, C), lambda i: (i, 0)),    # natural layout, contiguous rows
            pl.BlockSpec((1, tb), lambda i: (0, i)),    # targets, batch on lanes
        ],
        out_specs=pl.BlockSpec((1, 128), lambda i: (0, i)),   # disjoint, lane-dense
        compiler_params=pltpu.CompilerParams(
            dimension_semantics=("parallel",),   # no carried state -> both TCs on v7x
        ),
    )(pred, tgt)

    partials = out.reshape(grid_b, 128)[:, 0]     # one scalar per grid step
    return jnp.sum(partials) / jnp.float32(B)


def _reference(pred, target, smoothing=0.1, num_classes=5):
    # Pure-JAX reference mirroring the PyTorch forward.
    log_prob = jax.nn.log_softmax(pred.astype(jnp.float32), axis=1)
    true_dist = jnp.full_like(log_prob, smoothing / (num_classes - 1))
    true_dist = true_dist.at[jnp.arange(pred.shape[0]), target].set(1.0 - smoothing)
    return jnp.mean(jnp.sum(-true_dist * log_prob, axis=1))


if __name__ == "__main__":
    key = jax.random.PRNGKey(0)
    num_classes = 5
    smoothing = 0.1
    k1, k2, k3, k4 = jax.random.split(key, 4)

    # Case 1: tiny batch -> single grid step, blocks equal full array dims.
    b1 = 8
    pred1 = jax.random.normal(k1, (b1, num_classes), dtype=jnp.float32)
    tgt1 = jax.random.randint(k2, (b1,), 0, num_classes, dtype=jnp.int32)
    loss1 = jax.block_until_ready(
        label_smoothing_cross_entropy(pred1, tgt1, smoothing=smoothing,
                                      num_classes=num_classes))
    ref1 = _reference(pred1, tgt1, smoothing=smoothing, num_classes=num_classes)
    assert jnp.allclose(loss1, ref1, atol=1e-5, rtol=1e-5), (loss1, ref1)

    # Case 2: force a small tile to exercise the multi-step grid, the ragged final
    # block, the padding mask and the per-tile partial-sum outputs.
    b2 = 700
    pred2 = jax.random.normal(k3, (b2, num_classes), dtype=jnp.float32)
    tgt2 = jax.random.randint(k4, (b2,), 0, num_classes, dtype=jnp.int32)
    loss2 = jax.block_until_ready(
        label_smoothing_cross_entropy(pred2, tgt2, smoothing=smoothing,
                                      num_classes=num_classes, tile_rows=128))
    ref2 = _reference(pred2, tgt2, smoothing=smoothing, num_classes=num_classes)
    assert jnp.allclose(loss2, ref2, atol=1e-5, rtol=1e-5), (loss2, ref2)

    print("KERNEL_OK")
</pallas_src>

<mosaic_0001>
module attributes {stable_mosaic.version = 11 : i64} {
  func.func @_ls_ce_kernel(%arg0: i32, %arg1: memref<8x5xf32, #tpu.memory_space<vmem>>, %arg2: memref<1x8xi32, #tpu.memory_space<vmem>>, %arg3: memref<1x128xf32, #tpu.memory_space<vmem>>) attributes {dimension_semantics = [#tpu.dimension_semantics<parallel>], iteration_bounds = array<i64: 1>, scalar_prefetch = 0 : i64, scratch_operands = 0 : i64, tpu.core_type = #tpu.core_type<tc>, window_params = [{transform_indices = @transform_0, window_bounds = array<i64: 8, 5>}, {transform_indices = @transform_1, window_bounds = array<i64: 1, 8>}, {transform_indices = @transform_2, window_bounds = array<i64: 1, 128>}]} {
    %c0 = arith.constant 0 : index
    %c0_0 = arith.constant 0 : index
    %0 = vector.load %arg1[%c0, %c0_0] : memref<8x5xf32, #tpu.memory_space<vmem>>, vector<8x5xf32>
    %1 = tpu.transpose %0, [1, 0] : vector<8x5xf32> -> vector<5x8xf32>
    %c0_1 = arith.constant 0 : index
    %c0_2 = arith.constant 0 : index
    %2 = vector.load %arg2[%c0_1, %c0_2] : memref<1x8xi32, #tpu.memory_space<vmem>>, vector<1x8xi32>
    %cst = arith.constant dense<0xFF800000> : vector<8xf32>
    %3 = vector.multi_reduction <maximumf>, %1, %cst [0] : vector<5x8xf32> to vector<8xf32>
    %4 = vector.shape_cast %3 : vector<8xf32> to vector<1x8xf32>
    %5 = vector.broadcast %4 : vector<1x8xf32> to vector<5x8xf32>
    %6 = arith.subf %1, %5 : vector<5x8xf32>
    %7 = math.exp %6 : vector<5x8xf32>
    %cst_3 = arith.constant dense<0.000000e+00> : vector<8xf32>
    %8 = vector.multi_reduction <add>, %7, %cst_3 [0] : vector<5x8xf32> to vector<8xf32>
    %9 = vector.shape_cast %8 : vector<8xf32> to vector<1x8xf32>
    %10 = math.log %9 : vector<1x8xf32>
    %cst_4 = arith.constant dense<0.000000e+00> : vector<8xf32>
    %11 = vector.multi_reduction <add>, %6, %cst_4 [0] : vector<5x8xf32> to vector<8xf32>
    %12 = vector.shape_cast %11 : vector<8xf32> to vector<1x8xf32>
    %cst_5 = arith.constant 5.000000e+00 : f32
    %13 = vector.broadcast %cst_5 : f32 to vector<1x8xf32>
    %14 = arith.mulf %13, %10 : vector<1x8xf32>
    %15 = arith.subf %12, %14 : vector<1x8xf32>
    %16 = tpu.iota {dimensions = array<i32: 0>} : vector<5x8xi32>
    %17 = vector.broadcast %2 : vector<1x8xi32> to vector<5x8xi32>
    %18 = arith.cmpi eq, %16, %17 : vector<5x8xi32>
    %cst_6 = arith.constant 0.000000e+00 : f32
    %19 = vector.broadcast %cst_6 : f32 to vector<5x8xf32>
    %20 = arith.select %18, %6, %19 : vector<5x8xi1>, vector<5x8xf32>
    %cst_7 = arith.constant dense<0.000000e+00> : vector<8xf32>
    %21 = vector.multi_reduction <add>, %20, %cst_7 [0] : vector<5x8xf32> to vector<8xf32>
    %22 = vector.shape_cast %21 : vector<8xf32> to vector<1x8xf32>
    %23 = arith.subf %22, %10 : vector<1x8xf32>
    %cst_8 = arith.constant 8.750000e-01 : f32
    %24 = vector.broadcast %cst_8 : f32 to vector<1x8xf32>
    %25 = arith.mulf %24, %23 : vector<1x8xf32>
    %cst_9 = arith.constant 2.500000e-02 : f32
    %26 = vector.broadcast %cst_9 : f32 to vector<1x8xf32>
    %27 = arith.mulf %26, %15 : vector<1x8xf32>
    %28 = arith.addf %25, %27 : vector<1x8xf32>
    %cst_10 = arith.constant 0.000000e+00 : f32
    %29 = vector.broadcast %cst_10 : f32 to vector<1x8xf32>
    %30 = arith.subf %29, %28 : vector<1x8xf32>
    %c8_i32 = arith.constant 8 : i32
    %31 = arith.muli %arg0, %c8_i32 : i32
    %32 = tpu.iota {dimensions = array<i32: 1>} : vector<1x8xi32>
    %33 = vector.broadcast %31 : i32 to vector<1x8xi32>
    %34 = arith.addi %33, %32 : vector<1x8xi32>
    %c8_i32_11 = arith.constant 8 : i32
    %35 = vector.broadcast %c8_i32_11 : i32 to vector<1x8xi32>
    %36 = arith.cmpi slt, %34, %35 : vector<1x8xi32>
    %cst_12 = arith.constant 0.000000e+00 : f32
    %37 = vector.broadcast %cst_12 : f32 to vector<1x8xf32>
    %38 = arith.select %36, %30, %37 : vector<1x8xi1>, vector<1x8xf32>
    %cst_13 = arith.constant dense<0.000000e+00> : vector<1xf32>
    %39 = vector.multi_reduction <add>, %38, %cst_13 [1] : vector<1x8xf32> to vector<1xf32>
    %40 = vector.shape_cast %39 : vector<1xf32> to vector<1x1xf32>
    %41 = vector.shape_cast %40 : vector<1x1xf32> to vector<1x1xf32>
    %42 = vector.broadcast %41 : vector<1x1xf32> to vector<1x128xf32>
    %c0_14 = arith.constant 0 : index
    %c0_15 = arith.constant 0 : index
    %43 = vector.load %arg3[%c0_14, %c0_15] : memref<1x128xf32, #tpu.memory_space<vmem>>, vector<1x128xf32>
    tpu.vector_store %arg3[%c0_14, %c0_15], %42 {strides = array<i32>} : memref<1x128xf32, #tpu.memory_space<vmem>>, vector<1x128xf32>,
    return
  }
  func.func @transform_0(%arg0: i32) -> (i32, i32) {
    %c0_i32 = arith.constant 0 : i32
    %c0_i32_0 = arith.constant 0 : i32
    return %arg0, %c0_i32 : i32, i32
  }
  func.func @transform_1(%arg0: i32) -> (i32, i32) {
    %c0_i32 = arith.constant 0 : i32
    %c0_i32_0 = arith.constant 0 : i32
    return %c0_i32, %arg0 : i32, i32
  }
  func.func @transform_2(%arg0: i32) -> (i32, i32) {
    %c0_i32 = arith.constant 0 : i32
    %c0_i32_0 = arith.constant 0 : i32
    return %c0_i32, %arg0 : i32, i32
  }
}

</mosaic_0001>

<bundles_post_ra>
// kernel: tpu_custom_call.1
= control target key start
LH: loop header
LB: loop body
LE: loop exit
PB: predicated region body
PF: predicated region fallthrough
CT: control target
= control target key end

     0   :  { %7 = vsyncpa [#allocation3], 0  ;;  %s238_s0 = inlined_call_operand.hbm [shape: f32[8,5], index: 0, kind: input, shape index: {}]   ;;  %s239_s1 = inlined_call_operand.vmem [shape: s32[1,8], index: 1, kind: input, shape index: {}]   ;;  %s240_s2 = inlined_call_operand.hbm [shape: f32[1,128], index: 2, kind: output, shape index: {}]  }
   0x1   :  { %8 = vsyncpa [#allocation4], 0  ;;  %s190_s9 = smov [#allocation2]   ;;  %s142_s13 = scalar_lea.hbm %s238_s0, 128 }
   0x2   :  { %s15_s10 = sshll.u32 %s190_s9, 4  ;;  %p143_p0 = scmp.ne.s32.totalorder %s238_s0, %s142_s13  ;;  %s16_s10 = int_to_ptr.vmem [resolvable:$true] %s15_s10 }
   0x3   :  { %p146_p1 = scmp.lt.u32.totalorder %s142_s13, %s238_s0 }
   0x5   :  { %p148_p2 = pnand %p146_p1, %p143_p0 }
   0x7   :  { %151 = shalt.err (!%p148_p2)
}
   0x8   :  { %s152_s18 = scalar_lea.vmem %s16_s10, 128  ;;  %p157_p4 = scmp.lt.s32.totalorder %s16_s10, %s16_s10 }
   0x9   :  { %p153_p3 = scmp.ne.s32.totalorder %s16_s10, %s152_s18  ;;  %p158_p5 = scmp.lt.s32.totalorder %s152_s18, %s152_s18 }
   0xb   :  { %p159_p6 = por %p158_p5, %p157_p4 }
   0xd   :  { %p160_p7 = pnand %p159_p6, %p153_p3 }
   0xf   :  { %163 = shalt.err (!%p160_p7)
}
  0x10   :  { %18 = dma.hbm_to_vmem [thread:$0]  %s238_s0, 128, %s16_s10, [#allocation3]  }
  0x11   :  { %186 = dma.done.wait [#allocation3], 128  }
  0x12   :  { %187 = vsyncadd [#allocation3], 4294967168  ;;  %v24_v0 = vld [vmem:[#allocation2] sm:$0xff]  ;;  %vm58_vm0 = vcmask 61440   ;;  %v87_v11 = vlaneseq  ;;  %vm114_vm3 = vcmask 64512  }
  0x13   :  { %25 = vxpose.xlu0.b32.start.end [1/1] (short) (narrow) %v24_v0, 8  ;;  %v134_v13 = vld [vmem:[%s239_s1] ss:$0 sm:$0xff]  ;;  %s191_s1 = smov [#allocation5]  }
  0x14   :  { %v88_v12 = vshrl.u32 %v87_v11, 7  ;;  %v109_v42 = vand.u32 127, %v87_v11  ;;  %s125_s22 = sshll.u32 %s191_s1, 4  ;;  %s126_s22 = int_to_ptr.vmem [resolvable:$true] %s125_s22 }
  0x15   :  { %s164_s23 = scalar_lea.vmem %s126_s22, 16  ;;  %s168_s24 = scalar_lea.vmem %s126_s22, 32 }
  0x16   :  { %vm93_vm1 = vcmp.eq.s32.totalorder %v88_v12, %v134_v13  ;;  %vm112_vm2 = vcmp.lt.s32.totalorder %v109_v42, 8  ;;  %p165_p8 = scmp.ne.s32.totalorder %s126_s22, %s164_s23  ;;  %p169_p9 = scmp.lt.s32.totalorder %s126_s22, %s126_s22 }
  0x17   :  { %p170_p10 = scmp.lt.s32.totalorder %s168_s24, %s164_s23 }
  0x19   :  { %p171_p11 = por %p170_p10, %p169_p9 }
  0x1b   :  { %p172_p12 = pnand %p171_p11, %p165_p8 }
  0x93   :  { %v41_v1 = vpop.trf.xlu0 }
  0x94   :  { %v59_v2 = vsel %vm58_vm0, %v41_v1, -inf }
  0x95   :  { %v60_v3 = vrot.slane %v59_v2, 4 }
  0x97   :  { %v61_v4 = vmax.f32 %v59_v2, %v60_v3 }
  0x99   :  { %v62_v5 = vrot.slane %v61_v4, 2 }
  0x9b   :  { %v63_v6 = vmax.f32 %v61_v4, %v62_v5 }
  0x9d   :  { %v64_v7 = vrot.slane %v63_v6, 1 }
  0x9f   :  { %v65_v8 = vmax.f32 %v63_v6, %v64_v7 }
  0xa1   :  { %v66_v9 = vsub.f32 %v41_v1, %v65_v8 }
  0xa3   :  { %v67_v10 = vmul.f32 1.442695, %v66_v9  ;;  %v94_v14 = vsel %vm93_vm1, %v66_v9, 0.0  ;;  %v78_v20 = vsel %vm58_vm0, %v66_v9, 0.0 }
  0xa4   :  { %v95_v18 = vsel %vm58_vm0, %v94_v14, 0.0  ;;  %v79_v23 = vrot.slane %v78_v20, 4 }
  0xa5   :  { %138 = vpow2.f32 %v67_v10  ;;  %v96_v21 = vrot.slane %v95_v18, 4 }
  0xa6   :  { %v80_v27 = vadd.f32 %v79_v23, %v78_v20 }
  0xa7   :  { %v97_v25 = vadd.f32 %v96_v21, %v95_v18 }
  0xa8   :  { %v81_v30 = vrot.slane %v80_v27, 2 }
  0xa9   :  { %v98_v29 = vrot.slane %v97_v25, 2 }
  0xaa   :  { %v82_v32 = vadd.f32 %v81_v30, %v80_v27 }
  0xab   :  { %v99_v31 = vadd.f32 %v98_v29, %v97_v25 }
  0xac   :  { %v83_v34 = vrot.slane %v82_v32, 1 }
  0xad   :  { %v100_v33 = vrot.slane %v99_v31, 1 }
  0xae   :  { %v84_v38 = vadd.f32 %v83_v34, %v82_v32 }
  0xaf   :  { %v139_v15 = vpop.eup %138  ;;  %v101_v37 = vadd.f32 %v100_v33, %v99_v31 }
  0xb0   :  { %v69_v16 = vsel %vm58_vm0, %v139_v15, 0.0 }
  0xb1   :  { %v70_v17 = vrot.slane %v69_v16, 4 }
  0xb3   :  { %v71_v19 = vadd.f32 %v70_v17, %v69_v16 }
  0xb5   :  { %v72_v22 = vrot.slane %v71_v19, 2 }
  0xb7   :  { %v73_v24 = vadd.f32 %v72_v22, %v71_v19 }
  0xb9   :  { %v74_v26 = vrot.slane %v73_v24, 1 }
  0xbb   :  { %v75_v28 = vadd.f32 %v74_v26, %v73_v24 }
  0xbd   :  { %140 = vlog2.f32 %v75_v28 }
  0xc7   :  { %v141_v35 = vpop.eup %140 }
  0xc8   :  { %v77_v36 = vmul.f32 0.6931472, %v141_v35 }
  0xca   :  { %v85_v39 = vmul.f32 5.0, %v77_v36  ;;  %v102_v40 = vsub.f32 %v101_v37, %v77_v36 }
  0xcc   :  { %v86_v41 = vsub.f32 %v84_v38, %v85_v39  ;;  %v103_v43 = vmul.f32 0.875, %v102_v40 }
  0xce   :  { %v104_v44 = vmul.f32 0.025, %v86_v41 }
  0xd0   :  { %v105_v45 = vadd.f32 %v104_v44, %v103_v43 }
  0xd2   :  { %v106_v46 = vsub.f32 0.0, %v105_v45 }
  0xd4   :  { %v113_v47 = vsel %vm112_vm2, %v106_v46, 0.0 }
  0xd5   :  { %v115_v48 = vsel %vm114_vm3, %v113_v47, 0.0 }
  0xd6   :  { %116 = vadd.xlane.f32.xlu0 %v115_v48 }
 0x163   :  { %v117_v49 = vpop.xlane.xlu0 %116 }
 0x164   :  { %118 = vst [vmem:[#allocation5] sm:$0x1] %v117_v49 }
 0x165   :  { %175 = shalt.err (!%p172_p12)
}
 0x166   :  { %s176_s27 = scalar_lea.hbm %s240_s2, 16 }
 0x167   :  { %p177_p13 = scmp.ne.s32.totalorder %s240_s2, %s176_s27  ;;  %p180_p0 = scmp.lt.u32.totalorder %s176_s27, %s240_s2 }
 0x169   :  { %p182_p1 = pnand %p180_p0, %p177_p13 }
 0x16b   :  { %185 = shalt.err (!%p182_p1)
}
 0x16c   :  { %128 = dma.vmem_to_hbm [thread:$0]  %s126_s22, 16, %s240_s2, [#allocation4]  }
 0x16d   :  { %188 = dma.done.wait [#allocation4], 16  }
 0x16e   :  { %189 = vsyncadd [#allocation4], 4294967280 }
 0x16f   :  { %132 = vsyncpa [#allocation3], 1 }
 0x170   :  { %133 = vsyncpa [#allocation4], 1 }

</bundles_post_ra>
